<compile_context>
chip_gen: v6e
topology: v6e:2x2x1
jax: 0.10.0
libtpu: 0.0.40
codegen_flags: <defaults>
</compile_context>

<pallas_src>
import jax
import jax.numpy as jnp
from jax.experimental import pallas as pl
from jax.experimental.pallas import tpu as pltpu

EMB = 64   # embedding dim (rows of F)          -> input_size = (64, 10)
SEQ = 10   # words per sentence (cols of F)
MEM = 32   # number of memory slots (cols of H / W)


def entnet_fwd_kernel(ft_ref, et_ref, hpw_ref, hwt_ref, xyt_ref, zt_ref,
                      s_ref, g_ref, new_ht_ref):
    ft = ft_ref[...]                                   # (SEQ, EMB)        F^T
    et = et_ref[...]                                   # (BT, SEQ, EMB)    batch of E^T

    # s_b = sum_t F[:, t] * E_b[:, t]  -- lane-dense over EMB, sublane reduce over SEQ
    s_blk = jnp.sum(et * ft[None, :, :], axis=1)       # (BT, EMB)
    s_ref[...] = s_blk

    # G_b = softmax(s_b^T H + s_b^T W) = softmax(s_b @ (H + W))       -> (BT, MEM)
    logits = jnp.dot(s_blk, hpw_ref[...], preferred_element_type=jnp.float32)
    m = jnp.max(logits, axis=-1, keepdims=True)
    ex = jnp.exp(logits - m)
    denom = jnp.sum(ex, axis=-1, keepdims=True)
    g_ref[...] = ex * pl.reciprocal(denom, approx=True)

    # base^T = (X @ H + Y @ W)^T = [H^T | W^T] @ [X^T ; Y^T]  (one K=128 MXU pass,
    # sentence-independent, shared by the whole tile)
    base_t = jnp.dot(hwt_ref[...], xyt_ref[...],
                     preferred_element_type=jnp.float32)              # (MEM, EMB)

    # (Z @ s_b)^T for every sentence in the tile, batched and lane-dense over EMB
    zs = jnp.dot(s_blk, zt_ref[...], preferred_element_type=jnp.float32)  # (BT, EMB)

    # new_H_b^T = sigmoid(base^T + (Z s_b)^T broadcast over MEM rows)
    # Single vectorized sigmoid + single 64-lane-wide store for the whole tile.
    # TODO(synk): nn.Dropout(p=0.3) on X/Y/Z is treated as identity (eval mode);
    #             training-mode dropout would need pltpu.prng_* masks here.
    new_ht_ref[...] = jax.nn.sigmoid(base_t[None, :, :] + zs[:, None, :])


@jax.jit
def entnet_forward(E_batch, F, H, W, X, Y, Z):
    """E_batch: (B, EMB, SEQ) batch of sentence embeddings (PyTorch E layout per sentence).

    Returns:
      s     : (B, EMB)        -- per-sentence s (PyTorch's (EMB,1) column, laid out as a row)
      G     : (B, MEM)        -- per-sentence gate (PyTorch's (1,MEM))
      new_H : (B, EMB, MEM)   -- per-sentence memory update
    """
    B = E_batch.shape[0]
    # Two parallel tiles shard the batch across v7x's two TensorCores; on single-TC
    # v5e/v6e the second step is ~0.35us of overhead (negligible). Fall back to one
    # tile when the half-batch would not be sublane-aligned.
    nb = 2 if (B % 16 == 0) else 1
    assert B % 8 == 0 or nb == 1, f"batch {B} must be sublane-friendly"
    BT = B // nb

    # Layout plumbing (outside the kernel): lane-dense transposes and weight concat.
    FT = F.T                                        # (SEQ, EMB)
    ET = jnp.swapaxes(E_batch, 1, 2)                # (B, SEQ, EMB)
    HpW = H + W                                     # (EMB, MEM)    grid-invariant add
    HWt = jnp.concatenate([H.T, W.T], axis=1)       # (MEM, 2*EMB)  = [H^T | W^T]
    XYt = jnp.concatenate([X.T, Y.T], axis=0)       # (2*EMB, EMB)  = [X^T ; Y^T]
    Zt = Z.T                                        # (EMB, EMB)

    s, G, new_Ht = pl.pallas_call(
        entnet_fwd_kernel,
        out_shape=(
            jax.ShapeDtypeStruct((B, EMB), jnp.float32),        # s
            jax.ShapeDtypeStruct((B, MEM), jnp.float32),        # G
            jax.ShapeDtypeStruct((B, MEM, EMB), jnp.float32),   # new_H^T (lane-dense)
        ),
        grid=(nb,),
        in_specs=[
            pl.BlockSpec((SEQ, EMB), lambda i: (0, 0)),         # F^T        (shared)
            pl.BlockSpec((BT, SEQ, EMB), lambda i: (i, 0, 0)),  # E^T tile   (per step)
            pl.BlockSpec((EMB, MEM), lambda i: (0, 0)),         # H + W      (shared)
            pl.BlockSpec((MEM, 2 * EMB), lambda i: (0, 0)),     # [H^T|W^T]  (shared)
            pl.BlockSpec((2 * EMB, EMB), lambda i: (0, 0)),     # [X^T;Y^T]  (shared)
            pl.BlockSpec((EMB, EMB), lambda i: (0, 0)),         # Z^T        (shared)
        ],
        out_specs=(
            pl.BlockSpec((BT, EMB), lambda i: (i, 0)),
            pl.BlockSpec((BT, MEM), lambda i: (i, 0)),
            pl.BlockSpec((BT, MEM, EMB), lambda i: (i, 0, 0)),
        ),
        compiler_params=pltpu.CompilerParams(
            dimension_semantics=("parallel",),
        ),
    )(FT, ET, HpW, HWt, XYt, Zt)

    # Back to the PyTorch (EMB, MEM) orientation (layout plumbing, outside the kernel).
    new_H = jnp.swapaxes(new_Ht, 1, 2)                          # (B, EMB, MEM)
    return s, G, new_H


def _ref_forward(E_batch, F, H, W, X, Y, Z):
    # pure-JAX reference of the PyTorch forward (dropout in eval mode), vmapped over sentences
    def single(E):
        s = jnp.sum(F * E, axis=1, keepdims=True)                 # (EMB, 1)
        G = jax.nn.softmax(s.T @ H + s.T @ W, axis=1)             # (1, MEM)
        new_H = jax.nn.sigmoid(X @ H + Y @ W + Z @ s)             # (EMB, MEM)
        return s[:, 0], G[0], new_H
    return jax.vmap(single)(E_batch)


if __name__ == "__main__":
    B = 16  # small batch: 2 parallel tiles of 8 sentences
    key = jax.random.PRNGKey(0)
    kF, kH, kW, kX, kY, kZ, kE = jax.random.split(key, 7)
    std = 0.1
    F = std * jax.random.normal(kF, (EMB, SEQ), jnp.float32)      # params['F']
    H = std * jax.random.normal(kH, (EMB, MEM), jnp.float32)
    W = std * jax.random.normal(kW, (EMB, MEM), jnp.float32)
    X = std * jax.random.normal(kX, (EMB, EMB), jnp.float32)      # params['X']
    Y = std * jax.random.normal(kY, (EMB, EMB), jnp.float32)      # params['Y']
    Z = std * jax.random.normal(kZ, (EMB, EMB), jnp.float32)      # params['Z']
    E = std * jax.random.normal(kE, (B, EMB, SEQ), jnp.float32)   # batch of input sentences

    s, G, new_H = jax.block_until_ready(entnet_forward(E, F, H, W, X, Y, Z))

    s_r, G_r, new_H_r = _ref_forward(E, F, H, W, X, Y, Z)
    assert jnp.allclose(s, s_r, atol=1e-4, rtol=1e-4), \
        float(jnp.max(jnp.abs(s - s_r)))
    # G uses the EUP approximate reciprocal in the softmax denominator -> slightly
    # looser (still tight) tolerance.
    assert jnp.allclose(G, G_r, atol=1e-3, rtol=1e-3), \
        float(jnp.max(jnp.abs(G - G_r)))
    assert jnp.allclose(new_H, new_H_r, atol=1e-4, rtol=1e-4), \
        float(jnp.max(jnp.abs(new_H - new_H_r)))

    print("KERNEL_OK")
</pallas_src>

<mosaic_0001>
module attributes {stable_mosaic.version = 11 : i64} {
  func.func @entnet_fwd_kernel(%arg0: i32, %arg1: memref<10x64xf32, #tpu.memory_space<vmem>>, %arg2: memref<8x10x64xf32, #tpu.memory_space<vmem>>, %arg3: memref<64x32xf32, #tpu.memory_space<vmem>>, %arg4: memref<32x128xf32, #tpu.memory_space<vmem>>, %arg5: memref<128x64xf32, #tpu.memory_space<vmem>>, %arg6: memref<64x64xf32, #tpu.memory_space<vmem>>, %arg7: memref<8x64xf32, #tpu.memory_space<vmem>>, %arg8: memref<8x32xf32, #tpu.memory_space<vmem>>, %arg9: memref<8x32x64xf32, #tpu.memory_space<vmem>>) attributes {dimension_semantics = [#tpu.dimension_semantics<parallel>], iteration_bounds = array<i64: 2>, scalar_prefetch = 0 : i64, scratch_operands = 0 : i64, tpu.core_type = #tpu.core_type<tc>, window_params = [{pipeline_mode = #tpu.pipeline_mode<synchronous>, transform_indices = @transform_0, window_bounds = array<i64: 10, 64>}, {transform_indices = @transform_1, window_bounds = array<i64: 8, 10, 64>}, {pipeline_mode = #tpu.pipeline_mode<synchronous>, transform_indices = @transform_2, window_bounds = array<i64: 64, 32>}, {pipeline_mode = #tpu.pipeline_mode<synchronous>, transform_indices = @transform_3, window_bounds = array<i64: 32, 128>}, {pipeline_mode = #tpu.pipeline_mode<synchronous>, transform_indices = @transform_4, window_bounds = array<i64: 128, 64>}, {pipeline_mode = #tpu.pipeline_mode<synchronous>, transform_indices = @transform_5, window_bounds = array<i64: 64, 64>}, {transform_indices = @transform_6, window_bounds = array<i64: 8, 64>}, {transform_indices = @transform_7, window_bounds = array<i64: 8, 32>}, {transform_indices = @transform_8, window_bounds = array<i64: 8, 32, 64>}]} {
    %c0 = arith.constant 0 : index
    %c0_0 = arith.constant 0 : index
    %0 = vector.load %arg1[%c0, %c0_0] : memref<10x64xf32, #tpu.memory_space<vmem>>, vector<10x64xf32>
    %c0_1 = arith.constant 0 : index
    %c0_2 = arith.constant 0 : index
    %c0_3 = arith.constant 0 : index
    %1 = vector.load %arg2[%c0_1, %c0_2, %c0_3] : memref<8x10x64xf32, #tpu.memory_space<vmem>>, vector<8x10x64xf32>
    %2 = vector.shape_cast %0 : vector<10x64xf32> to vector<1x10x64xf32>
    %3 = vector.broadcast %2 : vector<1x10x64xf32> to vector<8x10x64xf32>
    %4 = arith.mulf %1, %3 : vector<8x10x64xf32>
    %cst = arith.constant dense<0.000000e+00> : vector<8x64xf32>
    %5 = vector.multi_reduction <add>, %4, %cst [1] : vector<8x10x64xf32> to vector<8x64xf32>
    %c0_4 = arith.constant 0 : index
    %c0_5 = arith.constant 0 : index
    %6 = vector.load %arg7[%c0_4, %c0_5] : memref<8x64xf32, #tpu.memory_space<vmem>>, vector<8x64xf32>
    tpu.vector_store %arg7[%c0_4, %c0_5], %5 {strides = array<i32>} : memref<8x64xf32, #tpu.memory_space<vmem>>, vector<8x64xf32>,
    %c0_6 = arith.constant 0 : index
    %c0_7 = arith.constant 0 : index
    %7 = vector.load %arg3[%c0_6, %c0_7] : memref<64x32xf32, #tpu.memory_space<vmem>>, vector<64x32xf32>
    %cst_8 = arith.constant dense<0.000000e+00> : vector<8x32xf32>
    %8 = tpu.matmul %5, %7, %cst_8 {dimension_numbers = #tpu.dot_dimension_numbers<[1], [0], [0], [1], [0, 0, 1, 1], [], []>} : vector<8x64xf32>, vector<64x32xf32>, vector<8x32xf32> -> vector<8x32xf32>
    %cst_9 = arith.constant dense<0xFF800000> : vector<8xf32>
    %9 = vector.multi_reduction <maximumf>, %8, %cst_9 [1] : vector<8x32xf32> to vector<8xf32>
    %10 = vector.shape_cast %9 : vector<8xf32> to vector<8x1xf32>
    %11 = vector.broadcast %10 : vector<8x1xf32> to vector<8x32xf32>
    %12 = arith.subf %8, %11 : vector<8x32xf32>
    %13 = math.exp %12 : vector<8x32xf32>
    %cst_10 = arith.constant dense<0.000000e+00> : vector<8xf32>
    %14 = vector.multi_reduction <add>, %13, %cst_10 [1] : vector<8x32xf32> to vector<8xf32>
    %15 = vector.shape_cast %14 : vector<8xf32> to vector<8x1xf32>
    %16 = tpu.reciprocal %15 {approx = true} : vector<8x1xf32> -> vector<8x1xf32>
    %17 = vector.broadcast %16 : vector<8x1xf32> to vector<8x32xf32>
    %18 = arith.mulf %13, %17 : vector<8x32xf32>
    %c0_11 = arith.constant 0 : index
    %c0_12 = arith.constant 0 : index
    %19 = vector.load %arg8[%c0_11, %c0_12] : memref<8x32xf32, #tpu.memory_space<vmem>>, vector<8x32xf32>
    tpu.vector_store %arg8[%c0_11, %c0_12], %18 {strides = array<i32>} : memref<8x32xf32, #tpu.memory_space<vmem>>, vector<8x32xf32>,
    %c0_13 = arith.constant 0 : index
    %c0_14 = arith.constant 0 : index
    %20 = vector.load %arg4[%c0_13, %c0_14] : memref<32x128xf32, #tpu.memory_space<vmem>>, vector<32x128xf32>
    %c0_15 = arith.constant 0 : index
    %c0_16 = arith.constant 0 : index
    %21 = vector.load %arg5[%c0_15, %c0_16] : memref<128x64xf32, #tpu.memory_space<vmem>>, vector<128x64xf32>
    %cst_17 = arith.constant dense<0.000000e+00> : vector<32x64xf32>
    %22 = tpu.matmul %20, %21, %cst_17 {dimension_numbers = #tpu.dot_dimension_numbers<[1], [0], [0], [1], [0, 0, 1, 1], [], []>} : vector<32x128xf32>, vector<128x64xf32>, vector<32x64xf32> -> vector<32x64xf32>
    %c0_18 = arith.constant 0 : index
    %c0_19 = arith.constant 0 : index
    %23 = vector.load %arg6[%c0_18, %c0_19] : memref<64x64xf32, #tpu.memory_space<vmem>>, vector<64x64xf32>
    %cst_20 = arith.constant dense<0.000000e+00> : vector<8x64xf32>
    %24 = tpu.matmul %5, %23, %cst_20 {dimension_numbers = #tpu.dot_dimension_numbers<[1], [0], [0], [1], [0, 0, 1, 1], [], []>} : vector<8x64xf32>, vector<64x64xf32>, vector<8x64xf32> -> vector<8x64xf32>
    %25 = vector.shape_cast %22 : vector<32x64xf32> to vector<1x32x64xf32>
    %26 = vector.shape_cast %24 : vector<8x64xf32> to vector<8x1x64xf32>
    %27 = vector.broadcast %25 : vector<1x32x64xf32> to vector<8x32x64xf32>
    %28 = vector.broadcast %26 : vector<8x1x64xf32> to vector<8x32x64xf32>
    %29 = arith.addf %27, %28 : vector<8x32x64xf32>
    %30 = arith.negf %29 : vector<8x32x64xf32>
    %31 = math.exp %30 : vector<8x32x64xf32>
    %cst_21 = arith.constant 1.000000e+00 : f32
    %32 = vector.broadcast %cst_21 : f32 to vector<8x32x64xf32>
    %33 = arith.addf %32, %31 : vector<8x32x64xf32>
    %34 = arith.divf %32, %33 : vector<8x32x64xf32>
    %c0_22 = arith.constant 0 : index
    %c0_23 = arith.constant 0 : index
    %c0_24 = arith.constant 0 : index
    %35 = vector.load %arg9[%c0_22, %c0_23, %c0_24] : memref<8x32x64xf32, #tpu.memory_space<vmem>>, vector<8x32x64xf32>
    tpu.vector_store %arg9[%c0_22, %c0_23, %c0_24], %34 {strides = array<i32>} : memref<8x32x64xf32, #tpu.memory_space<vmem>>, vector<8x32x64xf32>,
    return
  }
  func.func @transform_0(%arg0: i32) -> (i32, i32) {
    %c0_i32 = arith.constant 0 : i32
    %c0_i32_0 = arith.constant 0 : i32
    %c0_i32_1 = arith.constant 0 : i32
    return %c0_i32, %c0_i32_0 : i32, i32
  }
  func.func @transform_1(%arg0: i32) -> (i32, i32, i32) {
    %c0_i32 = arith.constant 0 : i32
    %c0_i32_0 = arith.constant 0 : i32
    %c0_i32_1 = arith.constant 0 : i32
    return %arg0, %c0_i32, %c0_i32_0 : i32, i32, i32
  }
  func.func @transform_2(%arg0: i32) -> (i32, i32) {
    %c0_i32 = arith.constant 0 : i32
    %c0_i32_0 = arith.constant 0 : i32
    %c0_i32_1 = arith.constant 0 : i32
    return %c0_i32, %c0_i32_0 : i32, i32
  }
  func.func @transform_3(%arg0: i32) -> (i32, i32) {
    %c0_i32 = arith.constant 0 : i32
    %c0_i32_0 = arith.constant 0 : i32
    %c0_i32_1 = arith.constant 0 : i32
    return %c0_i32, %c0_i32_0 : i32, i32
  }
  func.func @transform_4(%arg0: i32) -> (i32, i32) {
    %c0_i32 = arith.constant 0 : i32
    %c0_i32_0 = arith.constant 0 : i32
    %c0_i32_1 = arith.constant 0 : i32
    return %c0_i32, %c0_i32_0 : i32, i32
  }
  func.func @transform_5(%arg0: i32) -> (i32, i32) {
    %c0_i32 = arith.constant 0 : i32
    %c0_i32_0 = arith.constant 0 : i32
    %c0_i32_1 = arith.constant 0 : i32
    return %c0_i32, %c0_i32_0 : i32, i32
  }
  func.func @transform_6(%arg0: i32) -> (i32, i32) {
    %c0_i32 = arith.constant 0 : i32
    %c0_i32_0 = arith.constant 0 : i32
    return %arg0, %c0_i32 : i32, i32
  }
  func.func @transform_7(%arg0: i32) -> (i32, i32) {
    %c0_i32 = arith.constant 0 : i32
    %c0_i32_0 = arith.constant 0 : i32
    return %arg0, %c0_i32 : i32, i32
  }
  func.func @transform_8(%arg0: i32) -> (i32, i32, i32) {
    %c0_i32 = arith.constant 0 : i32
    %c0_i32_0 = arith.constant 0 : i32
    %c0_i32_1 = arith.constant 0 : i32
    return %arg0, %c0_i32, %c0_i32_0 : i32, i32, i32
  }
}

</mosaic_0001>

<bundles_post_ra>
// kernel: entnet_forward.1
= control target key start
LH: loop header
LB: loop body
LE: loop exit
PB: predicated region body
PF: predicated region fallthrough
CT: control target
= control target key end

     0   :  { %s2267_s0 = inlined_call_operand.vmem [shape: f32[10,64], index: 0, kind: input, shape index: {}]   ;;  %s2268_s1 = inlined_call_operand.vmem [shape: f32[16,10,64], index: 1, kind: input, shape index: {}]   ;;  %s2269_s2 = inlined_call_operand.vmem [shape: f32[64,32], index: 2, kind: input, shape index: {}]   ;;  %s2270_s3 = inlined_call_operand.vmem [shape: f32[32,128], index: 3, kind: input, shape index: {}]   ;;  %s2271_s4 = inlined_call_operand.vmem [shape: f32[128,64], index: 4, kind: input, shape index: {}]   ;;  %s2272_s5 = inlined_call_operand.vmem [shape: f32[64,64], index: 5, kind: input, shape index: {}]   ;;  %s2273_s6 = inlined_call_operand.hbm [shape: f32[16,64], index: 6, kind: output, shape index: {0}]   ;;  %s2274_s7 = inlined_call_operand.hbm [shape: f32[16,32], index: 7, kind: output, shape index: {1}]   ;;  %s2275_s8 = inlined_call_operand.hbm [shape: f32[16,32,64], index: 8, kind: output, shape index: {2}]  }
   0x1   :  { %2279 = sst [smem:[#allocation9_spill]] %s2267_s0 }
   0x2   :  { %2280 = sst [smem:[#allocation10_spill]] %s2268_s1 }
   0x3   :  { %14 = vsyncpa [#allocation3], 0 }
   0x4   :  { %16 = vsyncpa [#allocation3 + $0x1], 0 }
   0x5   :  { %17 = vsyncpa [#allocation5], 0 }
   0x6   :  { %19 = vsyncpa [#allocation5 + $0x1], 0  ;;  %s1784_s27 = smov 0   ;;  %s1786_s28 = smov 0  }
   0x7   :  { %s1788_s29 = smov 0   ;;  %s1790_s30 = smov 0  }
   0x8 LB: > { %s1805_s9 = sadd.s32 4294967295, %s1729_s30   ;;  %s2276_s10 = sadd.s32 4294967294, %s1729_s30   ;;  %s1729_s30 = sphi %s1790_s30, %s2291_s30   ;;  %s1725_s29 = sphi %s1788_s29, %s2290_s29   ;;  %s1721_s28 = sphi %s1786_s28, %s2289_s28   ;;  %s1717_s27 = sphi %s1784_s27, %s2288_s27  }
   0x9   : > { %s1809_s11 = sadd.s32 1, %s1729_s30   ;;  %s163_s12 = sadd.s32 1, %s1725_s29 }
   0xa   : > { %s160_s13 = ssub.s32 %s1729_s30, %s1809_s11  ;;  %p173_p0 = scmp.ne.s32.totalorder %s1725_s29, %s1721_s28 }
   0xb   : > { %p161_p1 = scmp.eq.s32.totalorder %s160_s13, 0  ;;  %p174_p2 = scmp.eq.s32.totalorder %s1805_s9, 1 }
   0xc   : > { %p179_p3 = scmp.ne.s32.totalorder %s1721_s28, %s1717_s27  ;;  %p180_p4 = scmp.eq.s32.totalorder %s2276_s10, 1 }
   0xd   : > { %s1822_s14 = scalar_select %p161_p1, %s1725_s29, %s163_s12  }
   0xe   : > { %p1824_p5 = por %p174_p2, %p173_p0  ;;  %p1828_p6 = por %p180_p4, %p179_p3 }
   0xf   : > { %p1259_p7 = scmp.ge.s32.totalorder %s1729_s30, 1  ;;  %p275_p8 = scmp.lt.s32.totalorder %s1729_s30, 3 }
  0x11   : > { %p276_p9 = pnand %p1259_p7, %p275_p8 }
  0x12   : > { %s1263_s19 = sshll.u32 (!%p276_p9), %s1805_s9, 3  ;;  %s2283_s0 = sld [smem:[#allocation9_spill]] (!%p276_p9) }
  0x13   : > { %279 = sbr.rel (%p276_p9) target bundleno = 598 (0x256), region = 44  ;;  %p321_p10 = scmp.lt.s32.totalorder (!%p276_p9), %s1263_s19, 15 }
  0x14   : > { %s2284_s1 = sld [smem:[#allocation10_spill]] (!%p276_p9)  ;;  %s2051_s21 = sand.u32 (!%p276_p9), 1, %s1721_s28  }
  0x15   : > { %s1262_s22 = sshll.u32 (!%p276_p9), %s2051_s21, 8  ;;  %s2278_s24 = sshll.u32 (!%p276_p9), %s1805_s9, 7 }
  0x16   : > { %s2060_s23 = scalar_lea.vmem (!%p276_p9), [#allocation6], %s1262_s22  ;;  %s2160_s13 = scalar_lea.hbm (!%p276_p9), %s2273_s6, %s2278_s24 }
  0x17   : > { %s1083_s17 = scalar_lea.sflag (!%p276_p9), [#allocation3], %s2051_s21  ;;  %s1734_s20 = smov (!%p276_p9), [#allocation2]  }
  0x18   : > { %v467_v0 = vld [vmem:[%s2269_s2 + $0x38] sm:$0xff]  ;;  %v1731_v1 = vmov 0.0   ;;  %v466_v2 = vld [vmem:[%s2269_s2 + $0x30] sm:$0xff]  ;;  %vm1732_vm0 = vmmov 0   ;;  %v465_v3 = vld [vmem:[%s2269_s2 + $0x28] sm:$0xff]  ;;  %s2293_s19 = smov (!%p321_p10, %s1263_s19), 15 }
  0x19   : > { %1351 = vmatprep.subr.mxu0 %v1731_v1  ;;  %1367 = vmatprep.mubr.msk.f32.mxu0 %vm1732_vm0, %v1731_v1  ;;  %v464_v4 = vld [vmem:[%s2269_s2 + $0x20] sm:$0xff]  ;;  %s1310_s26 = sshll.u32 %s2293_s19, 4  ;;  %v329_v6 = vld [vmem:[%s2283_s0 + $0x8] sm:$0x3]  ;;  %v463_v7 = vld [vmem:[%s2269_s2 + $0x18] sm:$0xff]  ;;  %vm362_vm1 = vcmask 523264  }
  0x1a   : > { %1352 = vmatpush3.msra.mxu0 %v467_v0  ;;  %v328_v5 = vld [vmem:[%s2283_s0] sm:$0xff]  ;;  %s1864_s10 = scalar_lea.vmem %s2284_s1, %s1310_s26  ;;  %v462_v8 = vld [vmem:[%s2269_s2 + $0x10] sm:$0xff]  ;;  %vm364_vm2 = vcmask 517120   ;;  %v461_v17 = vld [vmem:[%s2269_s2 + $0x8] sm:$0xff]  ;;  %vm444_vm3 = vcmask 1041409   ;;  %vm446_vm4 = vcmask 1042434  }
  0x1b   : > { %1353 = vmatprep.subr.mxu0 %v1731_v1  ;;  %v330_v9 = vld [vmem:[%s1864_s10] sm:$0xff]  ;;  %v331_v10 = vld [vmem:[%s1864_s10 + $0x8] sm:$0x3]  ;;  %v332_v11 = vld [vmem:[%s1864_s10 + $0x10] sm:$0xff]  ;;  %vm448_vm5 = vcmask 1043459   ;;  %vm450_vm6 = vcmask 1044484  }
  0x1c   : > { %1354 = vmatpush3.msra.mxu0 %v466_v2  ;;  %v333_v12 = vld [vmem:[%s1864_s10 + $0x18] sm:$0x3]  ;;  %v334_v13 = vld [vmem:[%s1864_s10 + $0x20] sm:$0xff]  ;;  %v335_v14 = vld [vmem:[%s1864_s10 + $0x28] sm:$0x3]  ;;  %v346_v15 = vmul.f32 %v330_v9, %v328_v5  ;;  %v347_v16 = vmul.f32 %v331_v10, %v329_v6  ;;  %v348_v21 = vmul.f32 %v332_v11, %v328_v5  ;;  %vm452_vm7 = vcmask 1045509  }
  0x1d   : > { %1355 = vmatprep.subr.mxu0 %v1731_v1  ;;  %v336_v18 = vld [vmem:[%s1864_s10 + $0x30] sm:$0xff]  ;;  %v337_v19 = vld [vmem:[%s1864_s10 + $0x38] sm:$0x3]  ;;  %v338_v20 = vld [vmem:[%s1864_s10 + $0x40] sm:$0xff]  ;;  %v349_v22 = vmul.f32 %v333_v12, %v329_v6  ;;  %v350_v23 = vmul.f32 %v334_v13, %v328_v5  ;;  %v351_v24 = vmul.f32 %v335_v14, %v329_v6  ;;  %vm454_vm8 = vcmask 1046534   ;;  %s2277_s19 = sshll.u32 %s2051_s21, 3 }
  0x1e   : > { %1356 = vmatpush3.msra.mxu0 %v465_v3  ;;  %v339_v25 = vld [vmem:[%s1864_s10 + $0x48] sm:$0x3]  ;;  %v340_v26 = vld [vmem:[%s1864_s10 + $0x50] sm:$0xff]  ;;  %v341_v27 = vld [vmem:[%s1864_s10 + $0x58] sm:$0x3]  ;;  %v352_v28 = vmul.f32 %v336_v18, %v328_v5  ;;  %v353_v29 = vmul.f32 %v337_v19, %v329_v6  ;;  %v354_v30 = vmul.f32 %v338_v20, %v328_v5  ;;  %v363_v31 = vsel %vm362_vm1, %v346_v15, 0.0 }
  0x1f   : > { %1357 = vmatprep.subr.mxu0 %v1731_v1  ;;  %v342_v32 = vld [vmem:[%s1864_s10 + $0x60] sm:$0xff]  ;;  %v343_v33 = vld [vmem:[%s1864_s10 + $0x68] sm:$0x3]  ;;  %v344_v34 = vld [vmem:[%s1864_s10 + $0x70] sm:$0xff]  ;;  %v355_v35 = vmul.f32 %v339_v25, %v329_v6  ;;  %v356_v36 = vmul.f32 %v340_v26, %v328_v5  ;;  %v357_v37 = vmul.f32 %v341_v27, %v329_v6  ;;  %v365_v38 = vsel %vm364_vm2, %v347_v16, 0.0  ;;  %s305_s25 = scalar_lea.vmem [#allocation2], %s2277_s19 }
  0x20   : > { %1358 = vmatpush3.msra.mxu0 %v464_v4  ;;  %v345_v39 = vld [vmem:[%s1864_s10 + $0x78] sm:$0x3]  ;;  %v358_v40 = vmul.f32 %v342_v32, %v328_v5  ;;  %v359_v41 = vmul.f32 %v343_v33, %v329_v6  ;;  %v360_v42 = vmul.f32 %v344_v34, %v328_v5  ;;  %v366_v43 = vadd.f32 %v365_v38, %v363_v31  ;;  %v460_v44 = vld [vmem:[%s2269_s2] sm:$0xff]  ;;  %s1106_s10 = sshll.u32 %s305_s25, 4  ;;  %s1617_s22 = sshll.u32 %s1734_s20, 4  ;;  %s1107_s10 = int_to_ptr.vmem [resolvable:$true] %s1106_s10  ;;  %s1618_s22 = int_to_ptr.vmem [resolvable:$false] %s1617_s22 }
  0x21   : > { %1359 = vmatprep.subr.mxu0 %v1731_v1  ;;  %v361_v45 = vmul.f32 %v345_v39, %v329_v6  ;;  %v373_v46 = vsel %vm362_vm1, %v348_v21, 0.0  ;;  %v374_v47 = vsel %vm364_vm2, %v349_v22, 0.0  ;;  %v382_v48 = vsel %vm362_vm1, %v350_v23, 0.0  ;;  %s1613_s18 = scalar_lea.vmem %s1107_s10, 128  ;;  %s1619_s19 = scalar_lea.vmem %s1618_s22, 256 }
  0x22   : > { %1360 = vmatpush3.msra.mxu0 %v463_v7  ;;  %v367_v49 = vrot.slane %v366_v43, 4  ;;  %v375_v50 = vadd.f32 %v374_v47, %v373_v46  ;;  %v383_v51 = vsel %vm364_vm2, %v351_v24, 0.0  ;;  %v391_v52 = vsel %vm362_vm1, %v352_v28, 0.0  ;;  %p1614_p11 = scmp.ne.s32.totalorder %s1107_s10, %s1613_s18  ;;  %p1620_p0 = scmp.lt.s32.totalorder %s1107_s10, %s1618_s22 }
  0x23   : > { %1361 = vmatprep.subr.mxu0 %v1731_v1  ;;  %v384_v53 = vadd.f32 %v383_v51, %v382_v48  ;;  %v392_v54 = vsel %vm364_vm2, %v353_v29, 0.0  ;;  %v400_v55 = vsel %vm362_vm1, %v354_v30, 0.0  ;;  %v401_v56 = vsel %vm364_vm2, %v355_v35, 0.0  ;;  %p1621_p1 = scmp.lt.s32.totalorder %s1619_s19, %s1613_s18 }
  0x24   : > { %1362 = vmatpush3.msra.mxu0 %v462_v8  ;;  %v368_v57 = vadd.f32 %v367_v49, %v366_v43  ;;  %v376_v58 = vrot.slane %v375_v50, 4  ;;  %v393_v59 = vadd.f32 %v392_v54, %v391_v52  ;;  %v402_v60 = vadd.f32 %v401_v56, %v400_v55  ;;  %p1615_p12 = pnand %p1614_p11, %p1824_p5 }
  0x25   : > { %1363 = vmatprep.subr.mxu0 %v1731_v1  ;;  %v385_v61 = vrot.slane %v384_v53, 4  ;;  %v409_v62 = vsel %vm362_vm1, %v356_v36, 0.0  ;;  %v410_v63 = vsel %vm364_vm2, %v357_v37, 0.0  ;;  %v418_v0 = vsel %vm362_vm1, %v358_v40, 0.0  ;;  %p1622_p2 = por %p1621_p1, %p1620_p0 }
  0x26   : > { %1364 = vmatpush3.msra.mxu0 %v461_v17  ;;  %v369_v2 = vrot.slane %v368_v57, 2  ;;  %v377_v3 = vadd.f32 %v376_v58, %v375_v50  ;;  %v394_v4 = vrot.slane %v393_v59, 4  ;;  %v403_v5 = vrot.slane %v402_v60, 4  ;;  %p1616_p13 = pneg %p1615_p12 }
  0x27   : > { %1365 = vmatprep.subr.mxu0 %v1731_v1  ;;  %v386_v6 = vadd.f32 %v385_v61, %v384_v53  ;;  %v411_v7 = vadd.f32 %v410_v63, %v409_v62  ;;  %v419_v8 = vsel %vm364_vm2, %v359_v41, 0.0  ;;  %v427_v9 = vsel %vm362_vm1, %v360_v42, 0.0  ;;  %v570_v61 = vld [vmem:[%s2271_s4 + $0x68] sm:$0xff]  ;;  %v665_v62 = vld [vmem:[%s2272_s5 + $0x38] sm:$0xff]  ;;  %v664_v63 = vld [vmem:[%s2272_s5 + $0x30] sm:$0xff] }
  0x28   : > { %1366 = vmatpush3.msra.mxu0 %v460_v44  ;;  %v370_v10 = vadd.f32 %v369_v2, %v368_v57  ;;  %v378_v11 = vrot.slane %v377_v3, 2  ;;  %v395_v12 = vadd.f32 %v394_v4, %v393_v59  ;;  %v404_v13 = vadd.f32 %v403_v5, %v402_v60  ;;  %v572_v59 = vld [vmem:[%s2271_s4 + $0x78] sm:$0xff]  ;;  %v571_v60 = vld [vmem:[%s2271_s4 + $0x70] sm:$0xff]  ;;  %v663_v2 = vld [vmem:[%s2272_s5 + $0x28] sm:$0xff]  ;;  %p1623_p3 = pnand %p1622_p2, %p1616_p13 }
  0x29   : > { %1408 = vmatprep.subr.mxu0 %v1731_v1  ;;  %v387_v14 = vrot.slane %v386_v6, 2  ;;  %v412_v15 = vrot.slane %v411_v7, 4  ;;  %v420_v16 = vadd.f32 %v419_v8, %v418_v0  ;;  %v428_v17 = vsel %vm364_vm2, %v361_v45, 0.0  ;;  %1370 = vmatprep.subr.mxu1 %v572_v59  ;;  %v569_v0 = vld [vmem:[%s2271_s4 + $0x60] sm:$0xff]  ;;  %v567_v5 = vld [vmem:[%s2271_s4 + $0x50] sm:$0xff] }
  0x2a   : > { %v371_v18 = vrot.slane %v370_v10, 1  ;;  %v379_v19 = vadd.f32 %v378_v11, %v377_v3  ;;  %v396_v20 = vrot.slane %v395_v12, 2  ;;  %v405_v21 = vrot.slane %v404_v13, 2  ;;  %1371 = vmatpush3.msra.mxu1 %v572_v59  ;;  %v568_v3 = vld [vmem:[%s2271_s4 + $0x58] sm:$0xff]  ;;  %v662_v4 = vld [vmem:[%s2272_s5 + $0x20] sm:$0xff]  ;;  %v660_v8 = vld [vmem:[%s2272_s5 + $0x10] sm:$0xff] }
  0x2b   : > { %v388_v22 = vadd.f32 %v387_v14, %v386_v6  ;;  %v413_v23 = vadd.f32 %v412_v15, %v411_v7  ;;  %v421_v24 = vrot.slane %v420_v16, 4  ;;  %v429_v25 = vadd.f32 %v428_v17, %v427_v9  ;;  %1372 = vmatprep.subr.mxu1 %v571_v60  ;;  %v661_v6 = vld [vmem:[%s2272_s5 + $0x18] sm:$0xff]  ;;  %v566_v7 = vld [vmem:[%s2271_s4 + $0x48] sm:$0xff]  ;;  %v565_v9 = vld [vmem:[%s2271_s4 + $0x40] sm:$0xff] }
  0x2c   : > { %v372_v26 = vadd.f32 %v371_v18, %v370_v10  ;;  %v380_v27 = vrot.slane %v379_v19, 1  ;;  %v397_v28 = vadd.f32 %v396_v20, %v395_v12  ;;  %v406_v29 = vadd.f32 %v405_v21, %v404_v13  ;;  %1373 = vmatpush3.msra.mxu1 %v571_v60  ;;  %v659_v10 = vld [vmem:[%s2272_s5 + $0x8] sm:$0xff]  ;;  %v564_v11 = vld [vmem:[%s2271_s4 + $0x38] sm:$0xff]  ;;  %v658_v12 = vld [vmem:[%s2272_s5] sm:$0xff] }
  0x2d   : > { %v389_v30 = vrot.slane %v388_v22, 1  ;;  %v414_v31 = vrot.slane %v413_v23, 2  ;;  %v422_v32 = vadd.f32 %v421_v24, %v420_v16  ;;  %v430_v33 = vrot.slane %v429_v25, 4  ;;  %1374 = vmatprep.subr.mxu1 %v570_v61  ;;  %v563_v13 = vld [vmem:[%s2271_s4 + $0x30] sm:$0xff]  ;;  %v553_v14 = vld [vmem:[%s2270_s3] sm:$0xff]  ;;  %v562_v15 = vld [vmem:[%s2271_s4 + $0x28] sm:$0xff] }
  0x2e   : > { %v381_v34 = vadd.f32 %v380_v27, %v379_v19  ;;  %v398_v35 = vrot.slane %v397_v28, 1  ;;  %v407_v36 = vrot.slane %v406_v29, 1  ;;  %vm456_vm9 = vcmask 1047559   ;;  %1375 = vmatpush3.msra.mxu1 %v570_v61  ;;  %1402 = vmatprep.mubr.f32.mxu1 %v553_v14  ;;  %v560_v16 = vld [vmem:[%s2271_s4 + $0x18] sm:$0xff]  ;;  %v559_v17 = vld [vmem:[%s2271_s4 + $0x10] sm:$0xff]  ;;  %v558_v18 = vld [vmem:[%s2271_s4 + $0x8] sm:$0xff] }
  0x2f   : > { %v390_v37 = vadd.f32 %v389_v30, %v388_v22  ;;  %v415_v38 = vadd.f32 %v414_v31, %v413_v23  ;;  %v423_v39 = vrot.slane %v422_v32, 2  ;;  %v431_v40 = vadd.f32 %v430_v33, %v429_v25  ;;  %1376 = vmatprep.subr.mxu1 %v569_v0  ;;  %v557_v19 = vld [vmem:[%s2271_s4] sm:$0xff]  ;;  %v554_v20 = vld [vmem:[%s2270_s3 + $0x8] sm:$0xff]  ;;  %v555_v21 = vld [vmem:[%s2270_s3 + $0x10] sm:$0xff] }
  0x30   : > { %v399_v41 = vadd.f32 %v398_v35, %v397_v28  ;;  %v408_v42 = vadd.f32 %v407_v36, %v406_v29  ;;  %v445_v43 = vsel %vm444_vm3, %v381_v34, %v372_v26  ;;  %1377 = vmatpush3.msra.mxu1 %v569_v0  ;;  %v556_v22 = vld [vmem:[%s2270_s3 + $0x18] sm:$0xff]  ;;  %vm540_vm10 = vcmask 261120  }
  0x31   : > { %v416_v44 = vrot.slane %v415_v38, 1  ;;  %v424_v45 = vadd.f32 %v423_v39, %v422_v32  ;;  %v432_v46 = vrot.slane %v431_v40, 2  ;;  %v447_v47 = vsel %vm446_vm4, %v390_v37, %v445_v43  ;;  %1378 = vmatprep.subr.mxu1 %v568_v3 }
  0x32   : > { %v449_v48 = vsel %vm448_vm5, %v399_v41, %v447_v47  ;;  %1379 = vmatpush3.msra.mxu1 %v568_v3  ;;  %v1733_v26 = vmov 1966171168   ;;  %v741_v28 = vlaneseq }
  0x33   : > { %v417_v49 = vadd.f32 %v416_v44, %v415_v38  ;;  %v425_v50 = vrot.slane %v424_v45, 1  ;;  %v433_v51 = vadd.f32 %v432_v46, %v431_v40  ;;  %v451_v52 = vsel %vm450_vm6, %v408_v42, %v449_v48  ;;  %1380 = vmatprep.subr.mxu1 %v567_v5 }
  0x34   : > { %1381 = vmatpush3.msra.mxu1 %v567_v5  ;;  %v739_v27 = vunpack.c.l.s4 %v1733_v26  ;;  %v742_v30 = vshrl.u32 %v741_v28, 7 }
  0x35   : > { %v426_v53 = vadd.f32 %v425_v50, %v424_v45  ;;  %v434_v54 = vrot.slane %v433_v51, 1  ;;  %v453_v55 = vsel %vm452_vm7, %v417_v49, %v451_v52  ;;  %1382 = vmatprep.subr.mxu1 %v566_v7 }
  0x36   : > { %1383 = vmatpush3.msra.mxu1 %v566_v7  ;;  %v740_v29 = vunpack.c.0.s8 %v739_v27  ;;  %v788_v45 = vsub.s32 0, %v742_v30 }
  0x37   : > { %v435_v56 = vadd.f32 %v434_v54, %v433_v51  ;;  %v455_v57 = vsel %vm454_vm8, %v426_v53, %v453_v55  ;;  %1384 = vmatprep.subr.mxu1 %v565_v9 }
  0x38   : > { %1385 = vmatpush3.msra.mxu1 %v565_v9  ;;  %v743_v31 = vsub.s32 %v740_v29, %v742_v30 }
  0x39   : > { %v1915_v58 = vsel %vm456_vm9, %v435_v56, %v455_v57  ;;  %1386 = vmatprep.subr.mxu1 %v564_v11 }
  0x3a   : > { %1368 = vmatmul.mubr.msk.f32.vlgmr.msra.gmra.mxu0 %vm362_vm1, %v1915_v58  ;;  %1387 = vmatpush3.msra.mxu1 %v564_v11  ;;  %459 = vst.msk [vmem:[%s305_s25] sm:$0xff] %vm362_vm1, %v1915_v58 }
  0x3b   : > { %1424 = vmatprep.mubr.msk.f32.mxu0 %vm1732_vm0, %v1731_v1  ;;  %1409 = vmatpush3.msra.mxu0 %v665_v62 }
  0x3c   : > { %1410 = vmatprep.subr.mxu0 %v1731_v1  ;;  %1388 = vmatprep.subr.mxu1 %v563_v13 }
  0x3d   : > { %1411 = vmatpush3.msra.mxu0 %v664_v63  ;;  %1389 = vmatpush3.msra.mxu1 %v563_v13 }
  0x3e   : > { %1412 = vmatprep.subr.mxu0 %v1731_v1  ;;  %1390 = vmatprep.subr.mxu1 %v562_v15 }
  0x3f   : > { %1413 = vmatpush3.msra.mxu0 %v663_v2  ;;  %1391 = vmatpush3.msra.mxu1 %v562_v15 }
  0x40   : > { %1414 = vmatprep.subr.mxu0 %v1731_v1 }
  0x41   : > { %1415 = vmatpush3.msra.mxu0 %v662_v4 }
  0x42   : > { %1416 = vmatprep.subr.mxu0 %v1731_v1 }
  0x43   : > { %1417 = vmatpush3.msra.mxu0 %v661_v6 }
  0x44   : > { %1418 = vmatprep.subr.mxu0 %v1731_v1 }
  0x45   : > { %1419 = vmatpush3.msra.mxu0 %v660_v8 }
  0x46   : > { %1420 = vmatprep.subr.mxu0 %v1731_v1 }
  0x47   : > { %1421 = vmatpush3.msra.mxu0 %v659_v10 }
  0x48   : > { %1422 = vmatprep.subr.mxu0 %v1731_v1  ;;  %v561_v1 = vld [vmem:[%s2271_s4 + $0x20] sm:$0xff] }
  0x49   : > { %1423 = vmatpush3.msra.mxu0 %v658_v12  ;;  %1392 = vmatprep.subr.mxu1 %v561_v1 }
  0x4a   : > { %1425 = vmatmul.mubr.msk.f32.vlgmr.msra.gmra.mxu0 %vm362_vm1, %v1915_v58  ;;  %1393 = vmatpush3.msra.mxu1 %v561_v1 }
  0x4b   : > { %1394 = vmatprep.subr.mxu1 %v560_v16 }
  0x4c   : > { %1395 = vmatpush3.msra.mxu1 %v560_v16 }
  0x4d   : > { %1396 = vmatprep.subr.mxu1 %v559_v17 }
  0x4e   : > { %1397 = vmatpush3.msra.mxu1 %v559_v17 }
  0x4f   : > { %1398 = vmatprep.subr.mxu1 %v558_v18 }
  0x50   : > { %1399 = vmatpush3.msra.mxu1 %v558_v18 }
  0x51   : > { %1400 = vmatprep.subr.mxu1 %v557_v19 }
  0x52   : > { %1401 = vmatpush3.msra.mxu1 %v557_v19 }
  0x53   : > { %1403 = vmatmul.mubr.f32.vlgmr.msra.gmra.mxu1 %v554_v20 }
  0x54   : > { %1405 = vmatprep.mubr.f32.mxu1 %v555_v21 }
  0x57   : > { %1406 = vmatmul.mubr.f32.gmra.mxu1 %v556_v22 }
  0xfa   : > { %v2014_v23 = vpop.f32.mrf.mxu0 }
  0xfb   : > { %v541_v24 = vsel %vm540_vm10, %v2014_v23, -inf }
  0xfc   : > { %542 = vmax.xlane.f32.xlu0 %v541_v24  ;;  %v1369_v25 = vpop.f32.mrf.mxu0 }
 0x10a   : > { %v732_v32 = vpop.f32.mrf.mxu0 }
 0x10b   : > { %v737_v33 = vcombine.high %v732_v32, %v732_v32  ;;  %v744_v34 = vrot.slane %v732_v32, %v743_v31 }
 0x10c   : > { %v1426_v35 = vpop.f32.mrf.mxu0 }
 0x10d   : > { %v751_v36 = vrot.slane %v737_v33, %v743_v31  ;;  %v752_v37 = vcombine.high %v744_v34, %v744_v34  ;;  %v760_v38 = vrot.slane %v744_v34, %v743_v31 }
 0x10f   : > { %v753_v39 = vcombine.high %v751_v36, %v751_v36  ;;  %v774_v40 = vrot.slane %v752_v37, %v743_v31  ;;  %v767_v41 = vrot.slane %v751_v36, %v743_v31  ;;  %v782_v43 = vcombine.high %v760_v38, %v760_v38 }
 0x110   : > { %v2018_v48 = vrot.slane %v760_v38, %v788_v45 }
 0x111   : > { %v781_v42 = vrot.slane %v753_v39, %v743_v31  ;;  %v784_v44 = vcombine.high %v774_v40, %v774_v40  ;;  %v783_v46 = vcombine.high %v767_v41, %v767_v41  ;;  %v2020_v49 = vrot.slane %v774_v40, %v788_v45 }
 0x112   : > { %v2022_v50 = vrot.slane %v782_v43, %v788_v45  ;;  %v2026_v52 = vrot.slane %v767_v41, %v788_v45 }
 0x113   : > { %v785_v47 = vcombine.high %v781_v42, %v781_v42  ;;  %v2024_v51 = vrot.slane %v784_v44, %v788_v45  ;;  %v2028_v53 = vrot.slane %v781_v42, %v788_v45  ;;  %v2030_v54 = vrot.slane %v783_v46, %v788_v45  ;;  %v1404_v56 = vpop.f32.mrf.mxu1 }
 0x114   : > { %v827_v57 = vadd.f32 %v1404_v56, %v2018_v48  ;;  %v831_v59 = vadd.f32 %v1404_v56, %v2020_v49  ;;  %v835_v60 = vadd.f32 %v1404_v56, %v2022_v50  ;;  %v843_v62 = vadd.f32 %v1404_v56, %v2026_v52 }
 0x115   : > { %v2032_v55 = vrot.slane %v785_v47, %v788_v45  ;;  %v839_v61 = vadd.f32 %v1404_v56, %v2024_v51  ;;  %v847_v63 = vadd.f32 %v1404_v56, %v2028_v53  ;;  %v851_v0 = vadd.f32 %v1404_v56, %v2030_v54  ;;  %v639_v7 = vpop.f32.mrf.mxu1 }
 0x116   : > { %v1269_v2 = vmul.f32 -1.442695, %v827_v57  ;;  %v1273_v3 = vmul.f32 -1.442695, %v831_v59  ;;  %v1277_v4 = vmul.f32 -1.442695, %v835_v60  ;;  %v826_v9 = vadd.f32 %v2018_v48, %v639_v7 }
 0x117   : > { %v855_v5 = vadd.f32 %v1404_v56, %v2032_v55  ;;  %v1281_v6 = vmul.f32 -1.442695, %v839_v61  ;;  %v1285_v8 = vmul.f32 -1.442695, %v843_v62  ;;  %v1289_v10 = vmul.f32 -1.442695, %v847_v63  ;;  %v1407_v57 = vpop.f32.mrf.mxu1 }
 0x118   : > { %1481 = vpow2.f32 %v1269_v2  ;;  %v830_v11 = vadd.f32 %v2020_v49, %v639_v7  ;;  %v1293_v12 = vmul.f32 -1.442695, %v851_v0  ;;  %v834_v13 = vadd.f32 %v2022_v50, %v639_v7 }
 0x119   : > { %1483 = vpow2.f32 %v1273_v3  ;;  %v1297_v14 = vmul.f32 -1.442695, %v855_v5  ;;  %v838_v15 = vadd.f32 %v2024_v51, %v639_v7  ;;  %v842_v1 = vadd.f32 %v2026_v52, %v639_v7 }
 0x11a   : > { %1485 = vpow2.f32 %v1277_v4  ;;  %v1268_v16 = vmul.f32 -1.442695, %v826_v9  ;;  %v846_v17 = vadd.f32 %v2028_v53, %v639_v7  ;;  %v1272_v18 = vmul.f32 -1.442695, %v830_v11 }
 0x11b   : > { %1487 = vpow2.f32 %v1281_v6  ;;  %v850_v19 = vadd.f32 %v2030_v54, %v639_v7  ;;  %v1276_v20 = vmul.f32 -1.442695, %v834_v13  ;;  %v854_v21 = vadd.f32 %v2032_v55, %v639_v7 }
 0x11c   : > { %1489 = vpow2.f32 %v1285_v8  ;;  %v1280_v22 = vmul.f32 -1.442695, %v838_v15  ;;  %v1284_v24 = vmul.f32 -1.442695, %v842_v1  ;;  %v1288_v25 = vmul.f32 -1.442695, %v846_v17 }
 0x11d   : > { %1491 = vpow2.f32 %v1289_v10  ;;  %v1292_v26 = vmul.f32 -1.442695, %v850_v19  ;;  %v1296_v27 = vmul.f32 -1.442695, %v854_v21  ;;  %v829_v61 = vadd.f32 %v1407_v57, %v2018_v48 }
 0x11e   : > { %1493 = vpow2.f32 %v1293_v12  ;;  %v833_v0 = vadd.f32 %v1407_v57, %v2020_v49  ;;  %v837_v4 = vadd.f32 %v1407_v57, %v2022_v50  ;;  %v841_v7 = vadd.f32 %v1407_v57, %v2024_v51 }
 0x11f   : > { %1495 = vpow2.f32 %v1297_v14  ;;  %v845_v10 = vadd.f32 %v1407_v57, %v2026_v52  ;;  %v1271_v11 = vmul.f32 -1.442695, %v829_v61  ;;  %v849_v14 = vadd.f32 %v1407_v57, %v2028_v53 }
 0x120   : > { %1497 = vpow2.f32 %v1268_v16  ;;  %v1275_v15 = vmul.f32 -1.442695, %v833_v0  ;;  %v853_v16 = vadd.f32 %v1407_v57, %v2030_v54  ;;  %v1279_v17 = vmul.f32 -1.442695, %v837_v4 }
 0x121   : > { %1499 = vpow2.f32 %v1272_v18  ;;  %v2065_v18 = vpop.f32.mrf.mxu1  ;;  %v1283_v21 = vmul.f32 -1.442695, %v841_v7 }
 0x122   : > { %1501 = vpow2.f32 %v1276_v20  ;;  %v857_v20 = vadd.f32 %v1407_v57, %v2032_v55 }
 0x123   : > { %1503 = vpow2.f32 %v1280_v22 }
 0x124   : > { %1505 = vpow2.f32 %v1284_v24  ;;  %v1287_v24 = vmul.f32 -1.442695, %v845_v10 }
 0x125   : > { %v1482_v28 = vpop.eup %1481  ;;  %1507 = vpow2.f32 %v1288_v25 }
 0x126   : > { %v1484_v29 = vpop.eup %1483  ;;  %v955_v30 = vadd.f32 1.0, %v1482_v28  ;;  %1509 = vpow2.f32 %v1292_v26  ;;  %v1291_v26 = vmul.f32 -1.442695, %v849_v14 }
 0x127   : > { %v1486_v31 = vpop.eup %1485  ;;  %v959_v32 = vadd.f32 1.0, %v1484_v29  ;;  %1511 = vpow2.f32 %v1296_v27  ;;  %v828_v27 = vadd.f32 %v2018_v48, %v2065_v18  ;;  %v1295_v29 = vmul.f32 -1.442695, %v853_v16 }
 0x128   : > { %v1488_v33 = vpop.eup %1487  ;;  %v963_v34 = vadd.f32 1.0, %v1486_v31  ;;  %1513 = vrcp.f32 %v955_v30  ;;  %v832_v30 = vadd.f32 %v2020_v49, %v2065_v18  ;;  %v840_v49 = vadd.f32 %v2024_v51, %v2065_v18 }
 0x129   : > { %v1490_v35 = vpop.eup %1489  ;;  %v967_v36 = vadd.f32 1.0, %v1488_v33  ;;  %1515 = vrcp.f32 %v959_v32  ;;  %v1299_v33 = vmul.f32 -1.442695, %v857_v20 }
 0x12a   : > { %v1492_v37 = vpop.eup %1491  ;;  %v971_v38 = vadd.f32 1.0, %v1490_v35  ;;  %1517 = vrcp.f32 %v963_v34  ;;  %v836_v34 = vadd.f32 %v2022_v50, %v2065_v18  ;;  %v1274_v51 = vmul.f32 -1.442695, %v832_v30 }
 0x12b   : > { %v1494_v39 = vpop.eup %1493  ;;  %v975_v40 = vadd.f32 1.0, %v1492_v37  ;;  %1519 = vrcp.f32 %v967_v36  ;;  %v844_v37 = vadd.f32 %v2026_v52, %v2065_v18  ;;  %v852_v52 = vadd.f32 %v2030_v54, %v2065_v18 }
 0x12c   : > { %v1496_v41 = vpop.eup %1495  ;;  %v979_v42 = vadd.f32 1.0, %v1494_v39  ;;  %1521 = vrcp.f32 %v971_v38  ;;  %v1270_v38 = vmul.f32 -1.442695, %v828_v27 }
 0x12d   : > { %v1498_v43 = vpop.eup %1497  ;;  %v983_v44 = vadd.f32 1.0, %v1496_v41  ;;  %1523 = vrcp.f32 %v975_v40  ;;  %v1278_v41 = vmul.f32 -1.442695, %v836_v34  ;;  %v1294_v54 = vmul.f32 -1.442695, %v852_v52 }
 0x12e   : > { %v1500_v45 = vpop.eup %1499  ;;  %1525 = vrcp.f32 %v979_v42  ;;  %v954_v46 = vadd.f32 1.0, %v1498_v43  ;;  %v1282_v43 = vmul.f32 -1.442695, %v840_v49 }
 0x12f   : > { %v1502_v47 = vpop.eup %1501  ;;  %1527 = vrcp.f32 %v983_v44  ;;  %v958_v56 = vadd.f32 1.0, %v1500_v45 }
 0x130   : > { %v1504_v59 = vpop.eup %1503  ;;  %v962_v60 = vadd.f32 1.0, %v1502_v47  ;;  %1529 = vrcp.f32 %v954_v46 }
 0x131   : > { %v1506_v62 = vpop.eup %1505  ;;  %v966_v63 = vadd.f32 1.0, %v1504_v59  ;;  %1531 = vrcp.f32 %v958_v56 }
 0x132   : > { %v1508_v2 = vpop.eup %1507  ;;  %v970_v3 = vadd.f32 1.0, %v1506_v62  ;;  %1533 = vrcp.f32 %v962_v60 }
 0x133   : > { %v1510_v5 = vpop.eup %1509  ;;  %v974_v6 = vadd.f32 1.0, %v1508_v2  ;;  %1535 = vrcp.f32 %v966_v63  ;;  %v856_v2 = vadd.f32 %v2032_v55, %v2065_v18 }
 0x134   : > { %v1512_v8 = vpop.eup %1511  ;;  %v978_v9 = vadd.f32 1.0, %v1510_v5  ;;  %1537 = vrcp.f32 %v970_v3 }
 0x135   : > { %v1514_v12 = vpop.eup %1513  ;;  %v982_v13 = vadd.f32 1.0, %v1512_v8  ;;  %1539 = vrcp.f32 %v974_v6 }
 0x136   : > { %v1516_v1 = vpop.eup %1515  ;;  %1051 = vst.msk [vmem:[%s2060_s23 + $0x8] sm:$0xff] %vm362_vm1, %v1514_v12  ;;  %1541 = vrcp.f32 %v978_v9 }
 0x137   : > { %v1518_v19 = vpop.eup %1517  ;;  %1055 = vst.msk [vmem:[%s2060_s23 + $0x28] sm:$0xff] %vm362_vm1, %v1516_v1  ;;  %1543 = vrcp.f32 %v982_v13 }
 0x138   : > { %v1520_v22 = vpop.eup %1519  ;;  %1059 = vst.msk [vmem:[%s2060_s23 + $0x48] sm:$0xff] %vm362_vm1, %v1518_v19  ;;  %1545 = vpow2.f32 %v1271_v11  ;;  %v1298_v11 = vmul.f32 -1.442695, %v856_v2 }
 0x139   : > { %v1522_v25 = vpop.eup %1521  ;;  %1063 = vst.msk [vmem:[%s2060_s23 + $0x68] sm:$0xff] %vm362_vm1, %v1520_v22  ;;  %1547 = vpow2.f32 %v1275_v15 }
 0x13a   : > { %v1524_v28 = vpop.eup %1523  ;;  %1067 = vst.msk [vmem:[%s2060_s23 + $0x88] sm:$0xff] %vm362_vm1, %v1522_v25  ;;  %1549 = vpow2.f32 %v1279_v17 }
 0x13b   : > { %v1526_v31 = vpop.eup %1525  ;;  %1071 = vst.msk [vmem:[%s2060_s23 + $0xa8] sm:$0xff] %vm362_vm1, %v1524_v28  ;;  %1551 = vpow2.f32 %v1283_v21 }
 0x13c   : > { %v1528_v48 = vpop.eup %1527  ;;  %1075 = vst.msk [vmem:[%s2060_s23 + $0xc8] sm:$0xff] %vm362_vm1, %v1526_v31  ;;  %1553 = vpow2.f32 %v1287_v24 }
 0x13d   : > { %v1530_v36 = vpop.eup %1529  ;;  %1079 = vst.msk [vmem:[%s2060_s23 + $0xe8] sm:$0xff] %vm362_vm1, %v1528_v48  ;;  %1555 = vpow2.f32 %v1291_v26 }
 0x13e   : > { %v1532_v50 = vpop.eup %1531  ;;  %1050 = vst.msk [vmem:[%s2060_s23] sm:$0xff] %vm362_vm1, %v1530_v36  ;;  %1557 = vpow2.f32 %v1295_v29 }
 0x13f   : > { %v1534_v40 = vpop.eup %1533  ;;  %1054 = vst.msk [vmem:[%s2060_s23 + $0x20] sm:$0xff] %vm362_vm1, %v1532_v50  ;;  %1559 = vpow2.f32 %v1299_v33 }
 0x140   : > { %v1536_v42 = vpop.eup %1535  ;;  %1058 = vst.msk [vmem:[%s2060_s23 + $0x40] sm:$0xff] %vm362_vm1, %v1534_v40 }
 0x141   : > { %v1538_v44 = vpop.eup %1537  ;;  %1062 = vst.msk [vmem:[%s2060_s23 + $0x60] sm:$0xff] %vm362_vm1, %v1536_v42 }
 0x142   : > { %v1540_v45 = vpop.eup %1539  ;;  %1066 = vst.msk [vmem:[%s2060_s23 + $0x80] sm:$0xff] %vm362_vm1, %v1538_v44 }
 0x143   : > { %v1542_v47 = vpop.eup %1541  ;;  %1070 = vst.msk [vmem:[%s2060_s23 + $0xa0] sm:$0xff] %vm362_vm1, %v1540_v45 }
 0x144   : > { %v1544_v56 = vpop.eup %1543  ;;  %1074 = vst.msk [vmem:[%s2060_s23 + $0xc0] sm:$0xff] %vm362_vm1, %v1542_v47 }
 0x145   : > { %v1546_v57 = vpop.eup %1545  ;;  %1078 = vst.msk [vmem:[%s2060_s23 + $0xe0] sm:$0xff] %vm362_vm1, %v1544_v56 }
 0x146   : > { %v1548_v59 = vpop.eup %1547  ;;  %v957_v60 = vadd.f32 1.0, %v1546_v57 }
 0x147   : > { %v1550_v61 = vpop.eup %1549  ;;  %v961_v62 = vadd.f32 1.0, %v1548_v59 }
 0x148   : > { %v1552_v63 = vpop.eup %1551  ;;  %v965_v0 = vadd.f32 1.0, %v1550_v61 }
 0x149   : > { %v1554_v3 = vpop.eup %1553  ;;  %v969_v4 = vadd.f32 1.0, %v1552_v63 }
 0x14a   : > { %v1556_v5 = vpop.eup %1555  ;;  %v973_v6 = vadd.f32 1.0, %v1554_v3 }
 0x14b   : > { %v1558_v7 = vpop.eup %1557  ;;  %v977_v8 = vadd.f32 1.0, %v1556_v5 }
 0x14c   : > { %v1560_v9 = vpop.eup %1559  ;;  %v981_v10 = vadd.f32 1.0, %v1558_v7 }
 0x14d   : > { %v985_v13 = vadd.f32 1.0, %v1560_v9 }
 0x185   : > { %v543_v32 = vpop.xlane.xlu0 %542 }
 0x186   : > { %v544_v35 = vsub.f32 %v2014_v23, %v543_v32  ;;  %v848_v23 = vadd.f32 %v2028_v53, %v2065_v18  ;;  %v1286_v53 = vmul.f32 -1.442695, %v844_v37 }
 0x188   : > { %v545_v39 = vmul.f32 1.442695, %v544_v35  ;;  %v1290_v46 = vmul.f32 -1.442695, %v848_v23 }
 0x18a   : > { %1561 = vpow2.f32 %v545_v39 }
 0x18b   : > { %1563 = vpow2.f32 %v1270_v38 }
 0x18c   : > { %1565 = vpow2.f32 %v1274_v51 }
 0x18d   : > { %1567 = vpow2.f32 %v1278_v41 }
 0x18e   : > { %1569 = vpow2.f32 %v1282_v43 }
 0x18f   : > { %1571 = vpow2.f32 %v1286_v53 }
 0x190   : > { %1573 = vpow2.f32 %v1290_v46 }
 0x191   : > { %1575 = vpow2.f32 %v1294_v54 }
 0x192   : > { %1577 = vrcp.f32 %v957_v60 }
 0x193   : > { %1579 = vrcp.f32 %v961_v62 }
 0x194   : > { %1581 = vrcp.f32 %v965_v0 }
 0x195   : > { %1583 = vrcp.f32 %v969_v4 }
 0x196   : > { %1585 = vrcp.f32 %v973_v6 }
 0x197   : > { %v2115_v12 = vpop.eup %1561  ;;  %1587 = vrcp.f32 %v977_v8 }
 0x198   : > { %v1564_v14 = vpop.eup %1563  ;;  %v547_v55 = vsel %vm540_vm10, %v2115_v12, 0.0  ;;  %1589 = vrcp.f32 %v981_v10 }
 0x199   : > { %v1566_v15 = vpop.eup %1565  ;;  %548 = vadd.xlane.f32.xlu0 %v547_v55  ;;  %1591 = vrcp.f32 %v985_v13  ;;  %v956_v1 = vadd.f32 1.0, %v1564_v14 }
 0x19a   : > { %v1568_v16 = vpop.eup %1567  ;;  %1593 = vpow2.f32 %v1298_v11  ;;  %v960_v17 = vadd.f32 1.0, %v1566_v15 }
 0x19b   : > { %v1570_v18 = vpop.eup %1569  ;;  %v964_v19 = vadd.f32 1.0, %v1568_v16  ;;  %1595 = vrcp.f32 %v956_v1 }
 0x19c   : > { %v1572_v20 = vpop.eup %1571  ;;  %v968_v21 = vadd.f32 1.0, %v1570_v18  ;;  %1597 = vrcp.f32 %v960_v17 }
 0x19d   : > { %v1574_v22 = vpop.eup %1573  ;;  %v972_v24 = vadd.f32 1.0, %v1572_v20  ;;  %1599 = vrcp.f32 %v964_v19 }
 0x19e   : > { %v1576_v25 = vpop.eup %1575  ;;  %v976_v26 = vadd.f32 1.0, %v1574_v22  ;;  %1601 = vrcp.f32 %v968_v21 }
 0x19f   : > { %v1578_v27 = vpop.eup %1577  ;;  %v980_v28 = vadd.f32 1.0, %v1576_v25  ;;  %1603 = vrcp.f32 %v972_v24 }
 0x1a0   : > { %v1580_v29 = vpop.eup %1579  ;;  %1053 = vst.msk [vmem:[%s2060_s23 + $0x18] sm:$0xff] %vm362_vm1, %v1578_v27  ;;  %1605 = vrcp.f32 %v976_v26 }
 0x1a1   : > { %v1582_v30 = vpop.eup %1581  ;;  %1057 = vst.msk [vmem:[%s2060_s23 + $0x38] sm:$0xff] %vm362_vm1, %v1580_v29  ;;  %1607 = vrcp.f32 %v980_v28 }
 0x1a2   : > { %v1584_v31 = vpop.eup %1583  ;;  %1061 = vst.msk [vmem:[%s2060_s23 + $0x58] sm:$0xff] %vm362_vm1, %v1582_v30 }
 0x1a3   : > { %v1586_v32 = vpop.eup %1585  ;;  %1065 = vst.msk [vmem:[%s2060_s23 + $0x78] sm:$0xff] %vm362_vm1, %v1584_v31 }
 0x1a4   : > { %v1588_v33 = vpop.eup %1587  ;;  %1069 = vst.msk [vmem:[%s2060_s23 + $0x98] sm:$0xff] %vm362_vm1, %v1586_v32 }
 0x1a5   : > { %v1590_v34 = vpop.eup %1589  ;;  %1073 = vst.msk [vmem:[%s2060_s23 + $0xb8] sm:$0xff] %vm362_vm1, %v1588_v33 }
 0x1a6   : > { %v1592_v48 = vpop.eup %1591  ;;  %1077 = vst.msk [vmem:[%s2060_s23 + $0xd8] sm:$0xff] %vm362_vm1, %v1590_v34 }
 0x1a7   : > { %v1594_v35 = vpop.eup %1593  ;;  %1081 = vst.msk [vmem:[%s2060_s23 + $0xf8] sm:$0xff] %vm362_vm1, %v1592_v48 }
 0x1a8   : > { %v1596_v49 = vpop.eup %1595  ;;  %v984_v36 = vadd.f32 1.0, %v1594_v35 }
 0x1a9   : > { %v1598_v37 = vpop.eup %1597  ;;  %1052 = vst.msk [vmem:[%s2060_s23 + $0x10] sm:$0xff] %vm362_vm1, %v1596_v49 }
 0x1aa   : > { %v1600_v38 = vpop.eup %1599  ;;  %1609 = vrcp.f32 %v984_v36  ;;  %1056 = vst.msk [vmem:[%s2060_s23 + $0x30] sm:$0xff] %vm362_vm1, %v1598_v37 }
 0x1ab   : > { %v1602_v50 = vpop.eup %1601  ;;  %1060 = vst.msk [vmem:[%s2060_s23 + $0x50] sm:$0xff] %vm362_vm1, %v1600_v38 }
 0x1ac   : > { %v1604_v39 = vpop.eup %1603  ;;  %1064 = vst.msk [vmem:[%s2060_s23 + $0x70] sm:$0xff] %vm362_vm1, %v1602_v50 }
 0x1ad   : > { %v1606_v23 = vpop.eup %1605  ;;  %1068 = vst.msk [vmem:[%s2060_s23 + $0x90] sm:$0xff] %vm362_vm1, %v1604_v39 }
 0x1ae   : > { %v1608_v51 = vpop.eup %1607  ;;  %1072 = vst.msk [vmem:[%s2060_s23 + $0xb0] sm:$0xff] %vm362_vm1, %v1606_v23 }
 0x1af   : > { %1076 = vst.msk [vmem:[%s2060_s23 + $0xd0] sm:$0xff] %vm362_vm1, %v1608_v51 }
 0x1b7   : > { %v1610_v40 = vpop.eup %1609 }
 0x1b8   : > { %1080 = vst.msk [vmem:[%s2060_s23 + $0xf0] sm:$0xff] %vm362_vm1, %v1610_v40 }
 0x1b9   : > { %1626 = shalt.err (!%p1623_p3)
}
 0x1ba   : > { %s1627_s25 = scalar_lea.hbm %s2160_s13, 128  ;;  %s1631_s20 = scalar_lea.hbm %s2273_s6, 256 }
 0x1bb   : > { %p1628_p4 = scmp.ne.s32.totalorder %s2160_s13, %s1627_s25  ;;  %p1632_p9 = scmp.lt.s32.totalorder %s2160_s13, %s2273_s6 }
 0x1bc   : > { %p1633_p10 = scmp.lt.s32.totalorder %s1631_s20, %s1627_s25 }
 0x1bd   : > { %p1629_p7 = pnand %p1628_p4, %p1824_p5 }
 0x1be   : > { %p1634_p11 = por %p1633_p10, %p1632_p9 }
 0x1bf   : > { %p1630_p8 = pneg %p1629_p7 }
 0x1c1   : > { %p1635_p12 = pnand %p1634_p11, %p1630_p8 }
 0x1c3   : > { %1638 = shalt.err (!%p1635_p12)
}
 0x1c4   : > { %1427 = dma.vmem_to_hbm [thread:$0]  (%p1824_p5), %s1107_s10, 128, %s2160_s13, %s1083_s17  }
 0x1c5   : > { %s1087_s19 = sand.u32 1, %s1805_s9   ;;  %s2285_s18 = sshll.u32 %s2051_s21, 3 }
 0x1c6   : > { %s312_s0 = scalar_lea.vmem [#allocation4], %s2285_s18  ;;  %s1312_s22 = sshll.u32 %s1805_s9, 12 }
 0x1c7   : > { %s1119_s24 = sshll.u32 %s312_s0, 4  ;;  %s1133_s25 = sshll.u32 %s2060_s23, 4  ;;  %s2193_s24 = int_to_ptr.vmem [resolvable:$true] %s1119_s24  ;;  %s2201_s25 = int_to_ptr.vmem [resolvable:$true] %s1133_s25 }
 0x1c8   : > { %s2286_s26 = sshll.u32 %s1805_s9, 7  ;;  %s2199_s10 = scalar_lea.hbm %s2275_s8, %s1312_s22 }
 0x1c9   : > { %s2191_s1 = scalar_lea.hbm %s2274_s7, %s2286_s26  ;;  %s2204_s9 = scalar_lea.sflag [#allocation5], %s1087_s19 }
 0x1ca   : > { %s1639_s23 = scalar_lea.vmem %s2193_s24, 128  ;;  %s1735_s17 = smov [#allocation4]  }
 0x1cb   : > { %p1640_p13 = scmp.ne.s32.totalorder %s2193_s24, %s1639_s23  ;;  %s1643_s18 = sshll.u32 %s1735_s17, 4  ;;  %s1644_s18 = int_to_ptr.vmem [resolvable:$false] %s1643_s18 }
 0x1cc   : > { %s1645_s26 = scalar_lea.vmem %s1644_s18, 256  ;;  %p1646_p2 = scmp.lt.s32.totalorder %s2193_s24, %s1644_s18 }
 0x1cd   : > { %p1641_p0 = pnand %p1640_p13, %p1824_p5  ;;  %p1647_p3 = scmp.lt.s32.totalorder %s1645_s26, %s1639_s23 }
 0x1cf   : > { %p1642_p1 = pneg %p1641_p0  ;;  %p1648_p4 = por %p1647_p3, %p1646_p2 }
 0x1d1   : > { %p1649_p7 = pnand %p1648_p4, %p1642_p1 }
 0x222   : > { %v549_v58 = vpop.xlane.xlu0 %548 }
 0x223   : > { %1611 = vrcp.f32 %v549_v58 }
 0x230   : > { %v1612_v52 = vpop.eup %1611 }
 0x231   : > { %v551_v41 = vmul.f32 %v1612_v52, %v2115_v12 }
 0x233   : > { %552 = vst.msk [vmem:[%s312_s0] sm:$0xff] %vm540_vm10, %v551_v41 }
 0x234   : > { %1652 = shalt.err (!%p1649_p7)
}
 0x235   : > { %s1653_s19 = scalar_lea.hbm %s2191_s1, 128  ;;  %s1657_s12 = scalar_lea.hbm %s2274_s7, 256 }
 0x236   : > { %p1654_p8 = scmp.ne.s32.totalorder %s2191_s1, %s1653_s19  ;;  %p1658_p11 = scmp.lt.s32.totalorder %s2191_s1, %s2274_s7 }
 0x237   : > { %p1659_p12 = scmp.lt.s32.totalorder %s1657_s12, %s1653_s19 }
 0x238   : > { %p1655_p9 = pnand %p1654_p8, %p1824_p5 }
 0x239   : > { %p1660_p13 = por %p1659_p12, %p1658_p11 }
 0x23a   : > { %p1656_p10 = pneg %p1655_p9 }
 0x23c   : > { %p1661_p0 = pnand %p1660_p13, %p1656_p10 }
 0x23e   : > { %1664 = shalt.err (!%p1661_p0)
}
 0x23f   : > { %1428 = dma.vmem_to_hbm [thread:$0]  (%p1824_p5), %s2193_s24, 128, %s2191_s1, %s2204_s9  }
 0x240   : > { %s1665_s21 = scalar_lea.vmem %s2201_s25, 4096  ;;  %s1736_s23 = smov [#allocation6]  }
 0x241   : > { %p1666_p1 = scmp.ne.s32.totalorder %s2201_s25, %s1665_s21  ;;  %s1669_s17 = sshll.u32 %s1736_s23, 4  ;;  %s1670_s17 = int_to_ptr.vmem [resolvable:$false] %s1669_s17 }
 0x242   : > { %s1671_s18 = scalar_lea.vmem %s1670_s17, 8192  ;;  %p1672_p4 = scmp.lt.s32.totalorder %s2201_s25, %s1670_s17 }
 0x243   : > { %p1667_p2 = pnand %p1666_p1, %p1824_p5  ;;  %p1673_p7 = scmp.lt.s32.totalorder %s1671_s18, %s1665_s21 }
 0x245   : > { %p1668_p3 = pneg %p1667_p2  ;;  %p1674_p8 = por %p1673_p7, %p1672_p4 }
 0x247   : > { %p1675_p9 = pnand %p1674_p8, %p1668_p3 }
 0x249   : > { %1678 = shalt.err (!%p1675_p9)
}
 0x24a   : > { %s1679_s26 = scalar_lea.hbm %s2199_s10, 4096  ;;  %s1683_s19 = scalar_lea.hbm %s2275_s8, 8192 }
 0x24b   : > { %p1680_p10 = scmp.ne.s32.totalorder %s2199_s10, %s1679_s26  ;;  %p1684_p13 = scmp.lt.s32.totalorder %s2199_s10, %s2275_s8 }
 0x24c   : > { %p1685_p0 = scmp.lt.s32.totalorder %s1683_s19, %s1679_s26 }
 0x24d   : > { %p1681_p11 = pnand %p1680_p10, %p1824_p5 }
 0x24e   : > { %p1686_p1 = por %p1685_p0, %p1684_p13 }
 0x24f   : > { %p1682_p12 = pneg %p1681_p11 }
 0x251   : > { %p1687_p2 = pnand %p1686_p1, %p1682_p12 }
 0x253   : > { %1690 = shalt.err (!%p1687_p2)
}
 0x254   : > { %s1737_s12 = smov 128   ;;  %s1738_s20 = smov 8  }
 0x255   : > { %1429 = dma.vmem_to_hbm [thread:$0]  (%p1824_p5), %s2201_s25, 4096, %s2199_s10, %s2204_s9, %s1737_s12, %s1737_s12, %s1738_s20  }
 0x256 PF: > { %p1443_p3 = scmp.ge.s32.totalorder %s1729_s30, 2  ;;  %s1148_s13 = sand.u32 1, %s1717_s27  }
 0x257   : > { %s1149_s21 = scalar_lea.sflag [#allocation3], %s1148_s13 }
 0x258   : > { %p1434_p4 = pnand %p1443_p3, %p1828_p6 }
 0x25a   : > { %p1435_p7 = pneg %p1434_p4 }
 0x25c   : > { %1708 = dma.done.wait (%p1435_p7), %s1149_s21, 128  }
 0x25d   : > { %1710 = vsyncadd (%p1435_p7), %s1149_s21, 4294967168  ;;  %s2287_s23 = sadd.s32 4294967294, %s1729_s30  }
 0x25e   : > { %s1157_s17 = sand.u32 1, %s2287_s23  }
 0x25f   : > { %s1158_s18 = scalar_lea.sflag [#allocation5], %s1157_s17 }
 0x260   : > { %1712 = dma.done.wait (%p1435_p7), %s1158_s18, 4224  }
 0x261   : > { %1714 = vsyncadd (%p1435_p7), %s1158_s18, 4294963072  ;;  %p22_p5 = scmp.ge.s32.totalorder %s1809_s11, 4   ;;  %s2288_s27 = smov %s1721_s28 }
 0x262   : > { %s2289_s28 = smov %s1725_s29  ;;  %s2290_s29 = smov %s1822_s14 }
 0x263   : > { %s2291_s30 = smov %s1809_s11  ;;  %24 = sbr.rel (!%p22_p5) target bundleno = 8 (0x8), region = 111 }
 0x268   :  { %1172 = vsyncpa [#allocation3], 1 }
 0x269   :  { %1174 = vsyncpa [#allocation3 + $0x1], 1 }
 0x26a   :  { %1175 = vsyncpa [#allocation5], 1 }
 0x26b   :  { %1177 = vsyncpa [#allocation5 + $0x1], 1 }

</bundles_post_ra>
